<compile_context>
chip_gen: v7x
topology: tpu7x:2x2x1
jax: 0.10.0
libtpu: 0.0.40
codegen_flags: <defaults>
</compile_context>

<pallas_src>
import math
import functools

import jax
import jax.numpy as jnp
from jax.experimental import pallas as pl
from jax.experimental.pallas import tpu as pltpu

_LANES = 128            # TPU lane width; each QKV segment is padded to this boundary
_OUT_SUB = 8            # classifier outputs padded 2 -> 8 (one sublane group)
_ROWS_PER_STEP = 1024   # target MXU M rows per grid step (VMEM-budget clamped)


# --------------------------------------------------------------------------- kernel

def _attention_head_kernel(
    x_ref,                       # (TB, S, H) f32
    wqkv_ref, bqkv_ref,          # (H, 3*Hseg) matmul dtype (Q pre-scaled), (1, 3*Hseg) f32
    gamma_ref, beta_ref,         # (1, H) f32 LayerNorm params
    wc_ref, bc_ref,              # (_OUT_SUB, H) matmul dtype zero-padded, (_OUT_SUB, 1) f32
    out_ref,                     # (1, _OUT_SUB, TB*S)
    *,
    eps: float,
    matmul_dtype,
):
    TB, S, H = x_ref.shape
    R = TB * S
    Hseg = wqkv_ref.shape[1] // 3

    x2 = x_ref[...].reshape(R, H)            # f32, reused for the residual below
    xm = x2.astype(matmul_dtype)             # MXU operand dtype

    # ---- fused Q/K/V projection: one MXU matmul, segments 128-lane aligned ----
    qkv = jnp.dot(xm, wqkv_ref[...], preferred_element_type=jnp.float32) + bqkv_ref[...]
    q3 = qkv[:, 0:H].reshape(TB, S, H).astype(matmul_dtype)
    k3 = qkv[:, Hseg:Hseg + H].reshape(TB, S, H).astype(matmul_dtype)
    v3 = qkv[:, 2 * Hseg:2 * Hseg + H].reshape(TB, S, H).astype(matmul_dtype)

    # ---- attention: batched QK^T, contraction on last dims (no transpose) ----
    # 1/sqrt(H) is already folded into the Q segment of wqkv / bqkv by prepare_params.
    scores = jnp.einsum("bqd,bkd->bqk", q3, k3,
                        preferred_element_type=jnp.float32)       # (TB, S, S) f32
    m = jnp.max(scores, axis=-1, keepdims=True)
    p = jnp.exp(scores - m)
    inv_den = pl.reciprocal(jnp.sum(p, axis=-1, keepdims=True), approx=True)
    attn = (p * inv_den).astype(matmul_dtype)
    logits = jnp.einsum("bqk,bkd->bqd", attn, v3,
                        preferred_element_type=jnp.float32)       # (TB, S, H) f32
    logits = logits.reshape(R, H)

    # ---- exact GELU (erf form, matching nn.GELU default) ----
    logits = 0.5 * logits * (1.0 + jax.lax.erf(logits * (1.0 / math.sqrt(2.0))))

    # ---- dropout: eval-mode identity ----

    # ---- residual + LayerNorm over last axis (f32) ----
    h = x2 + logits
    mean = jnp.mean(h, axis=-1, keepdims=True)
    var = jnp.mean((h - mean) ** 2, axis=-1, keepdims=True)       # biased, as in PyTorch
    normed = (h - mean) * jax.lax.rsqrt(var + eps)
    normed = normed * gamma_ref[...] + beta_ref[...]

    # ---- classifier: (OUT_SUB, H) . (R, H)^T -> (OUT_SUB, R); tokens on the lane axis ----
    out = jax.lax.dot_general(wc_ref[...], normed.astype(matmul_dtype),
                              (((1,), (1,)), ((), ())),
                              preferred_element_type=jnp.float32)
    out = out + bc_ref[...]                                       # (OUT_SUB, 1) bias
    out_ref[...] = out.reshape(1, _OUT_SUB, R).astype(out_ref.dtype)


# --------------------------------------------------------------------------- tiling policy

@functools.lru_cache(maxsize=1)
def _chip_info():
    """(vmem_capacity_bytes, num_tensorcores); conservative fallback if undetectable."""
    vmem = 64 * 1024 * 1024     # conservative (v7x-sized) fallback
    cores = 1
    try:
        info = pltpu.get_tpu_info()
        vmem = int(getattr(info, "vmem_capacity_bytes", vmem) or vmem)
        for attr in ("num_cores", "core_count", "num_tensorcores", "tensorcore_count"):
            val = getattr(info, attr, None)
            if val:
                cores = int(val)
                break
    except Exception:
        pass
    return vmem, cores


def _vmem_bytes_per_step(tb, S, H, Hseg, mm_bytes):
    """Rough per-grid-step VMEM estimate: IO blocks (double-buffered) + f32 intermediates."""
    R = tb * S
    x_io = 2 * R * H * 4                                   # x block, double-buffered
    out_io = 2 * _OUT_SUB * R * 4                          # output block, double-buffered
    qkv = R * 3 * Hseg * 4 + 3 * R * H * (4 + mm_bytes)    # fused qkv f32 + q/k/v slices+casts
    attn = 2 * tb * S * S * 4                              # scores + exp(scores)
    elem = 3 * R * H * 4                                   # gelu / residual / normed temporaries
    weights = 2 * (H * 3 * Hseg * mm_bytes + 3 * Hseg * 4
                   + 2 * H * 4 + _OUT_SUB * H * mm_bytes + _OUT_SUB * 4)
    return x_io + out_io + qkv + attn + elem + weights


def _pick_block_b(B, S, H, Hseg, mm_bytes, vmem_budget, num_cores):
    """Batch elements per grid step.

    Single grid step whenever the whole batch fits the rows/VMEM budget (v5e/v6e have one
    TensorCore, so extra steps are pure per-step overhead).  Split across cores only when
    the chip reports >=2 TensorCores AND each core still gets >= ~256 rows of work.
    """
    tb = min(B, max(1, _ROWS_PER_STEP // max(S, 1)))
    while tb > 1 and _vmem_bytes_per_step(tb, S, H, Hseg, mm_bytes) > vmem_budget:
        tb = max(1, tb // 2)
    if num_cores >= 2 and B >= num_cores and B * S >= num_cores * 256:
        tb = min(tb, pl.cdiv(B, num_cores))
    return max(tb, 1)


# --------------------------------------------------------------------------- weight prep

def prepare_params(params, *, matmul_dtype=jnp.bfloat16):
    """One-time weight prep (hoist out of the hot path): transpose to (in,out), fold the
    1/sqrt(H) softmax scale into the Q segment, fuse QKV into a single 128-lane-aligned
    weight, and pad the classifier to 8 output rows (token dimension goes on lanes)."""
    H = params["wq"].shape[0]
    OUT = params["wc"].shape[0]
    Hseg = pl.cdiv(H, _LANES) * _LANES
    inv_sqrt_h = 1.0 / math.sqrt(H)

    wqkv = jnp.zeros((H, 3 * Hseg), matmul_dtype)
    wqkv = wqkv.at[:, 0:H].set((params["wq"].T * inv_sqrt_h).astype(matmul_dtype))
    wqkv = wqkv.at[:, Hseg:Hseg + H].set(params["wk"].T.astype(matmul_dtype))
    wqkv = wqkv.at[:, 2 * Hseg:2 * Hseg + H].set(params["wv"].T.astype(matmul_dtype))

    bqkv = jnp.zeros((1, 3 * Hseg), jnp.float32)
    bqkv = bqkv.at[0, 0:H].set(params["bq"] * inv_sqrt_h)
    bqkv = bqkv.at[0, Hseg:Hseg + H].set(params["bk"])
    bqkv = bqkv.at[0, 2 * Hseg:2 * Hseg + H].set(params["bv"])

    wc = jnp.zeros((_OUT_SUB, H), matmul_dtype).at[:OUT, :].set(
        params["wc"].astype(matmul_dtype))
    bc = jnp.zeros((_OUT_SUB, 1), jnp.float32).at[:OUT, 0].set(params["bc"])

    return {
        "w_qkv": wqkv, "b_qkv": bqkv,
        "ln_gamma": params["ln_gamma"].reshape(1, H).astype(jnp.float32),
        "ln_beta": params["ln_beta"].reshape(1, H).astype(jnp.float32),
        "w_cls": wc, "b_cls": bc,
        "hidden": H, "out": OUT, "hseg": Hseg, "matmul_dtype": matmul_dtype,
    }


# --------------------------------------------------------------------------- wrapper

def custom_head_attention_with_ln(x, params, *, eps=1e-5, matmul_dtype=jnp.bfloat16,
                                  block_b=None, single_buffer_weights=False):
    """x: (B, S, H) float32.  params: raw dict (init_params) or prepped (prepare_params)."""
    if "w_qkv" not in params:
        params = prepare_params(params, matmul_dtype=matmul_dtype)
    p = params
    matmul_dtype = p["matmul_dtype"]

    B, S, H = x.shape
    assert H == p["hidden"], "hidden size mismatch vs prepared params"
    # S is ideally a multiple of 8 so the (R,H)<->(TB,S,H) reshapes stay copy-free.
    OUT = p["out"]
    Hseg = p["hseg"]
    mm_bytes = jnp.dtype(matmul_dtype).itemsize

    vmem_cap, num_cores = _chip_info()
    vmem_limit = int(min(vmem_cap // 2, 64 * 1024 * 1024))

    if block_b is None:
        TB = _pick_block_b(B, S, H, Hseg, mm_bytes, vmem_limit // 2, num_cores)
    else:
        TB = max(1, min(block_b, B))
    nb = pl.cdiv(B, TB)
    B_pad = nb * TB
    # Padded batch rows are zeros: softmax -> uniform, LN -> 0 * rsqrt(eps); finite, sliced away.
    x_in = x if B_pad == B else jnp.pad(x, ((0, B_pad - B), (0, 0), (0, 0)))
    R = TB * S

    # Replicated (constant-index) weight blocks; Buffered(1) optionally halves their VMEM
    # footprint (matters for v7x's 64 MiB VMEM at realistic H; negligible at H=32).
    wmode = {"pipeline_mode": pl.Buffered(1)} if single_buffer_weights else {}

    def rep(shape):
        return pl.BlockSpec(shape, lambda b: (0,) * len(shape), **wmode)

    kernel = functools.partial(_attention_head_kernel, eps=eps, matmul_dtype=matmul_dtype)

    out = pl.pallas_call(
        kernel,
        out_shape=jax.ShapeDtypeStruct((nb, _OUT_SUB, R), x.dtype),
        grid=(nb,),
        in_specs=[
            pl.BlockSpec((TB, S, H), lambda b: (b, 0, 0)),         # x
            rep((H, 3 * Hseg)), rep((1, 3 * Hseg)),                # fused Wqkv, bqkv
            rep((1, H)), rep((1, H)),                              # LN gamma, beta
            rep((_OUT_SUB, H)), rep((_OUT_SUB, 1)),                # classifier W, b (padded)
        ],
        out_specs=pl.BlockSpec((1, _OUT_SUB, R), lambda b: (b, 0, 0)),
        compiler_params=pltpu.CompilerParams(
            dimension_semantics=("parallel",),
            vmem_limit_bytes=vmem_limit,
        ),
    )(x_in, p["w_qkv"], p["b_qkv"], p["ln_gamma"], p["ln_beta"], p["w_cls"], p["b_cls"])

    # (nb, 8, TB*S) -> (B_pad, S, 8) -> slice real batch rows / real classes (tiny arrays).
    out = out.transpose(0, 2, 1).reshape(B_pad, S, _OUT_SUB)
    return out[:B, :, :OUT]


# --------------------------------------------------------------------------- test harness

def init_params(key, hidden_size):
    """Deterministic synthetic parameters matching the module's __init__ shapes."""
    keys = jax.random.split(key, 8)
    H = hidden_size
    scale = 1.0 / math.sqrt(H)
    return {
        "wq": jax.random.normal(keys[0], (H, H), jnp.float32) * scale,
        "bq": jax.random.normal(keys[1], (H,), jnp.float32) * 0.01,
        "wk": jax.random.normal(keys[2], (H, H), jnp.float32) * scale,
        "bk": jax.random.normal(keys[3], (H,), jnp.float32) * 0.01,
        "wv": jax.random.normal(keys[4], (H, H), jnp.float32) * scale,
        "bv": jax.random.normal(keys[5], (H,), jnp.float32) * 0.01,
        "wc": jax.random.normal(keys[6], (2, H), jnp.float32) * scale,
        "bc": jax.random.normal(keys[7], (2,), jnp.float32) * 0.01,
        "ln_gamma": jnp.ones((H,), jnp.float32),
        "ln_beta": jnp.zeros((H,), jnp.float32),
    }


def _reference(x, params, eps=1e-5):
    """Pure-JAX f32 reference of the PyTorch forward (eval mode)."""
    H = x.shape[-1]
    q = x @ params["wq"].T + params["bq"]
    k = x @ params["wk"].T + params["bk"]
    v = x @ params["wv"].T + params["bv"]
    scores = jnp.einsum("bqh,bkh->bqk", q, k) / math.sqrt(H)
    attn = jax.nn.softmax(scores, axis=-1)
    logits = jnp.einsum("bqk,bkh->bqh", attn, v)
    logits = jax.nn.gelu(logits, approximate=False)
    h = x + logits
    mean = jnp.mean(h, axis=-1, keepdims=True)
    var = jnp.mean((h - mean) ** 2, axis=-1, keepdims=True)
    normed = (h - mean) / jnp.sqrt(var + eps)
    normed = normed * params["ln_gamma"] + params["ln_beta"]
    return normed @ params["wc"].T + params["bc"]


if __name__ == "__main__":
    B, S, H = 2, 8, 32   # small shapes consistent with the module (hidden_size=32)
    key = jax.random.PRNGKey(0)
    k_x, k_p, k_x2 = jax.random.split(key, 3)
    x = jax.random.normal(k_x, (B, S, H), jnp.float32)
    params = init_params(k_p, H)
    ref = _reference(x, params)

    # Exact-semantics path: f32 MXU operands (tolerance covers the approx reciprocal).
    out_f32 = jax.block_until_ready(
        custom_head_attention_with_ln(x, params, matmul_dtype=jnp.float32))
    assert out_f32.shape == (B, S, 2), out_f32.shape
    assert jnp.allclose(out_f32, ref, atol=5e-3, rtol=5e-3), \
        float(jnp.max(jnp.abs(out_f32 - ref)))

    # Fast path (default): bf16 MXU operands, f32 accumulation; weight prep hoisted once.
    prepped = prepare_params(params)             # bf16 prep, reusable across calls
    out_bf16 = jax.block_until_ready(custom_head_attention_with_ln(x, prepped))
    assert out_bf16.shape == (B, S, 2), out_bf16.shape
    assert jnp.allclose(out_bf16, ref, atol=1e-1, rtol=1e-1), \
        float(jnp.max(jnp.abs(out_bf16 - ref)))

    # Multi-batch-per-grid-step + ragged-batch padding path (TB=2, B=5 -> padded to 6).
    B2 = 5
    x2 = jax.random.normal(k_x2, (B2, S, H), jnp.float32)
    ref2 = _reference(x2, params)
    out2 = jax.block_until_ready(
        custom_head_attention_with_ln(x2, params, matmul_dtype=jnp.float32, block_b=2))
    assert out2.shape == (B2, S, 2), out2.shape
    assert jnp.allclose(out2, ref2, atol=5e-3, rtol=5e-3), \
        float(jnp.max(jnp.abs(out2 - ref2)))

    print("KERNEL_OK")
</pallas_src>

<mosaic_0001>
module attributes {stable_mosaic.version = 11 : i64} {
  func.func @_attention_head_kernel(%arg0: i32, %arg1: memref<2x8x32xf32, #tpu.memory_space<vmem>>, %arg2: memref<32x384xf32, #tpu.memory_space<vmem>>, %arg3: memref<1x384xf32, #tpu.memory_space<vmem>>, %arg4: memref<1x32xf32, #tpu.memory_space<vmem>>, %arg5: memref<1x32xf32, #tpu.memory_space<vmem>>, %arg6: memref<8x32xf32, #tpu.memory_space<vmem>>, %arg7: memref<8x1xf32, #tpu.memory_space<vmem>>, %arg8: memref<1x8x16xf32, #tpu.memory_space<vmem>>) attributes {dimension_semantics = [#tpu.dimension_semantics<parallel>], iteration_bounds = array<i64: 1>, scalar_prefetch = 0 : i64, scratch_operands = 0 : i64, tpu.core_type = #tpu.core_type<tc>, window_params = [{transform_indices = @transform_0, window_bounds = array<i64: 2, 8, 32>}, {pipeline_mode = #tpu.pipeline_mode<synchronous>, transform_indices = @transform_1, window_bounds = array<i64: 32, 384>}, {pipeline_mode = #tpu.pipeline_mode<synchronous>, transform_indices = @transform_2, window_bounds = array<i64: 1, 384>}, {pipeline_mode = #tpu.pipeline_mode<synchronous>, transform_indices = @transform_3, window_bounds = array<i64: 1, 32>}, {pipeline_mode = #tpu.pipeline_mode<synchronous>, transform_indices = @transform_4, window_bounds = array<i64: 1, 32>}, {pipeline_mode = #tpu.pipeline_mode<synchronous>, transform_indices = @transform_5, window_bounds = array<i64: 8, 32>}, {pipeline_mode = #tpu.pipeline_mode<synchronous>, transform_indices = @transform_6, window_bounds = array<i64: 8, 1>}, {transform_indices = @transform_7, window_bounds = array<i64: 1, 8, 16>}]} {
    %c0 = arith.constant 0 : index
    %c0_0 = arith.constant 0 : index
    %c0_1 = arith.constant 0 : index
    %0 = vector.load %arg1[%c0, %c0_0, %c0_1] : memref<2x8x32xf32, #tpu.memory_space<vmem>>, vector<2x8x32xf32>
    %1 = vector.shape_cast %0 : vector<2x8x32xf32> to vector<16x32xf32>
    %c0_2 = arith.constant 0 : index
    %c0_3 = arith.constant 0 : index
    %2 = vector.load %arg2[%c0_2, %c0_3] : memref<32x384xf32, #tpu.memory_space<vmem>>, vector<32x384xf32>
    %cst = arith.constant dense<0.000000e+00> : vector<16x384xf32>
    %3 = tpu.matmul %1, %2, %cst {dimension_numbers = #tpu.dot_dimension_numbers<[1], [0], [0], [1], [0, 0, 1, 1], [], []>} : vector<16x32xf32>, vector<32x384xf32>, vector<16x384xf32> -> vector<16x384xf32>
    %c0_4 = arith.constant 0 : index
    %c0_5 = arith.constant 0 : index
    %4 = vector.load %arg3[%c0_4, %c0_5] : memref<1x384xf32, #tpu.memory_space<vmem>>, vector<1x384xf32>
    %5 = vector.broadcast %4 : vector<1x384xf32> to vector<16x384xf32>
    %6 = arith.addf %3, %5 : vector<16x384xf32>
    %7 = vector.extract_strided_slice %6 {offsets = [0, 0], sizes = [16, 32], strides = [1, 1]} : vector<16x384xf32> to vector<16x32xf32>
    %8 = vector.shape_cast %7 : vector<16x32xf32> to vector<2x8x32xf32>
    %9 = vector.extract_strided_slice %6 {offsets = [0, 128], sizes = [16, 32], strides = [1, 1]} : vector<16x384xf32> to vector<16x32xf32>
    %10 = vector.shape_cast %9 : vector<16x32xf32> to vector<2x8x32xf32>
    %11 = vector.extract_strided_slice %6 {offsets = [0, 256], sizes = [16, 32], strides = [1, 1]} : vector<16x384xf32> to vector<16x32xf32>
    %12 = vector.shape_cast %11 : vector<16x32xf32> to vector<2x8x32xf32>
    "tpu.trace_start"() <{level = 10 : i32, message = "bqd,bkd->bqk"}> : () -> ()
    %cst_6 = arith.constant dense<0.000000e+00> : vector<2x8x8xf32>
    %13 = tpu.matmul %8, %10, %cst_6 {dimension_numbers = #tpu.dot_dimension_numbers<[2], [2], [1], [1], [0, 0, 0, 1, 1, 1], [0], [0]>} : vector<2x8x32xf32>, vector<2x8x32xf32>, vector<2x8x8xf32> -> vector<2x8x8xf32>
    "tpu.trace_stop"() : () -> ()
    %cst_7 = arith.constant dense<0xFF800000> : vector<2x8xf32>
    %14 = vector.multi_reduction <maximumf>, %13, %cst_7 [2] : vector<2x8x8xf32> to vector<2x8xf32>
    %15 = vector.shape_cast %14 : vector<2x8xf32> to vector<2x8x1xf32>
    %16 = vector.broadcast %15 : vector<2x8x1xf32> to vector<2x8x8xf32>
    %17 = arith.subf %13, %16 : vector<2x8x8xf32>
    %18 = math.exp %17 : vector<2x8x8xf32>
    %cst_8 = arith.constant dense<0.000000e+00> : vector<2x8xf32>
    %19 = vector.multi_reduction <add>, %18, %cst_8 [2] : vector<2x8x8xf32> to vector<2x8xf32>
    %20 = vector.shape_cast %19 : vector<2x8xf32> to vector<2x8x1xf32>
    %21 = tpu.reciprocal %20 {approx = true} : vector<2x8x1xf32> -> vector<2x8x1xf32>
    %22 = vector.broadcast %21 : vector<2x8x1xf32> to vector<2x8x8xf32>
    %23 = arith.mulf %18, %22 : vector<2x8x8xf32>
    "tpu.trace_start"() <{level = 10 : i32, message = "bqk,bkd->bqd"}> : () -> ()
    %cst_9 = arith.constant dense<0.000000e+00> : vector<2x8x32xf32>
    %24 = tpu.matmul %23, %12, %cst_9 {dimension_numbers = #tpu.dot_dimension_numbers<[2], [1], [1], [2], [0, 0, 0, 1, 1, 2], [0], [0]>} : vector<2x8x8xf32>, vector<2x8x32xf32>, vector<2x8x32xf32> -> vector<2x8x32xf32>
    "tpu.trace_stop"() : () -> ()
    %25 = vector.shape_cast %24 : vector<2x8x32xf32> to vector<16x32xf32>
    %cst_10 = arith.constant 5.000000e-01 : f32
    %26 = vector.broadcast %cst_10 : f32 to vector<16x32xf32>
    %27 = arith.mulf %26, %25 : vector<16x32xf32>
    %cst_11 = arith.constant 0.707106769 : f32
    %28 = vector.broadcast %cst_11 : f32 to vector<16x32xf32>
    %29 = arith.mulf %25, %28 : vector<16x32xf32>
    %30 = math.erf %29 : vector<16x32xf32>
    %cst_12 = arith.constant 1.000000e+00 : f32
    %31 = vector.broadcast %cst_12 : f32 to vector<16x32xf32>
    %32 = arith.addf %31, %30 : vector<16x32xf32>
    %33 = arith.mulf %27, %32 : vector<16x32xf32>
    %34 = arith.addf %1, %33 : vector<16x32xf32>
    %cst_13 = arith.constant dense<0.000000e+00> : vector<16xf32>
    %35 = vector.multi_reduction <add>, %34, %cst_13 [1] : vector<16x32xf32> to vector<16xf32>
    %36 = vector.shape_cast %35 : vector<16xf32> to vector<16x1xf32>
    %cst_14 = arith.constant 3.200000e+01 : f32
    %37 = vector.broadcast %cst_14 : f32 to vector<16x1xf32>
    %38 = arith.divf %36, %37 : vector<16x1xf32>
    %39 = vector.broadcast %38 : vector<16x1xf32> to vector<16x32xf32>
    %40 = arith.subf %34, %39 : vector<16x32xf32>
    %41 = arith.mulf %40, %40 : vector<16x32xf32>
    %cst_15 = arith.constant dense<0.000000e+00> : vector<16xf32>
    %42 = vector.multi_reduction <add>, %41, %cst_15 [1] : vector<16x32xf32> to vector<16xf32>
    %43 = vector.shape_cast %42 : vector<16xf32> to vector<16x1xf32>
    %cst_16 = arith.constant 3.200000e+01 : f32
    %44 = vector.broadcast %cst_16 : f32 to vector<16x1xf32>
    %45 = arith.divf %43, %44 : vector<16x1xf32>
    %46 = vector.broadcast %38 : vector<16x1xf32> to vector<16x32xf32>
    %47 = arith.subf %34, %46 : vector<16x32xf32>
    %cst_17 = arith.constant 9.99999974E-6 : f32
    %48 = vector.broadcast %cst_17 : f32 to vector<16x1xf32>
    %49 = arith.addf %45, %48 : vector<16x1xf32>
    %50 = math.rsqrt %49 : vector<16x1xf32>
    %51 = vector.broadcast %50 : vector<16x1xf32> to vector<16x32xf32>
    %52 = arith.mulf %47, %51 : vector<16x32xf32>
    %c0_18 = arith.constant 0 : index
    %c0_19 = arith.constant 0 : index
    %53 = vector.load %arg4[%c0_18, %c0_19] : memref<1x32xf32, #tpu.memory_space<vmem>>, vector<1x32xf32>
    %54 = vector.broadcast %53 : vector<1x32xf32> to vector<16x32xf32>
    %55 = arith.mulf %52, %54 : vector<16x32xf32>
    %c0_20 = arith.constant 0 : index
    %c0_21 = arith.constant 0 : index
    %56 = vector.load %arg5[%c0_20, %c0_21] : memref<1x32xf32, #tpu.memory_space<vmem>>, vector<1x32xf32>
    %57 = vector.broadcast %56 : vector<1x32xf32> to vector<16x32xf32>
    %58 = arith.addf %55, %57 : vector<16x32xf32>
    %c0_22 = arith.constant 0 : index
    %c0_23 = arith.constant 0 : index
    %59 = vector.load %arg6[%c0_22, %c0_23] : memref<8x32xf32, #tpu.memory_space<vmem>>, vector<8x32xf32>
    %cst_24 = arith.constant dense<0.000000e+00> : vector<8x16xf32>
    %60 = tpu.matmul %59, %58, %cst_24 {dimension_numbers = #tpu.dot_dimension_numbers<[1], [1], [0], [0], [0, 0, 1, 0], [], []>} : vector<8x32xf32>, vector<16x32xf32>, vector<8x16xf32> -> vector<8x16xf32>
    %c0_25 = arith.constant 0 : index
    %c0_26 = arith.constant 0 : index
    %61 = vector.load %arg7[%c0_25, %c0_26] : memref<8x1xf32, #tpu.memory_space<vmem>>, vector<8x1xf32>
    %62 = vector.broadcast %61 : vector<8x1xf32> to vector<8x16xf32>
    %63 = arith.addf %60, %62 : vector<8x16xf32>
    %64 = vector.shape_cast %63 : vector<8x16xf32> to vector<1x8x16xf32>
    %c0_27 = arith.constant 0 : index
    %c0_28 = arith.constant 0 : index
    %c0_29 = arith.constant 0 : index
    %65 = vector.load %arg8[%c0_27, %c0_28, %c0_29] : memref<1x8x16xf32, #tpu.memory_space<vmem>>, vector<1x8x16xf32>
    tpu.vector_store %arg8[%c0_27, %c0_28, %c0_29], %64 {strides = array<i32>} : memref<1x8x16xf32, #tpu.memory_space<vmem>>, vector<1x8x16xf32>,
    return
  }
  func.func @transform_0(%arg0: i32) -> (i32, i32, i32) {
    %c0_i32 = arith.constant 0 : i32
    %c0_i32_0 = arith.constant 0 : i32
    %c0_i32_1 = arith.constant 0 : i32
    return %arg0, %c0_i32, %c0_i32_0 : i32, i32, i32
  }
  func.func @transform_1(%arg0: i32) -> (i32, i32) {
    %c0_i32 = arith.constant 0 : i32
    %c0_i32_0 = arith.constant 0 : i32
    %c0_i32_1 = arith.constant 0 : i32
    return %c0_i32, %c0_i32_0 : i32, i32
  }
  func.func @transform_2(%arg0: i32) -> (i32, i32) {
    %c0_i32 = arith.constant 0 : i32
    %c0_i32_0 = arith.constant 0 : i32
    %c0_i32_1 = arith.constant 0 : i32
    return %c0_i32, %c0_i32_0 : i32, i32
  }
  func.func @transform_3(%arg0: i32) -> (i32, i32) {
    %c0_i32 = arith.constant 0 : i32
    %c0_i32_0 = arith.constant 0 : i32
    %c0_i32_1 = arith.constant 0 : i32
    return %c0_i32, %c0_i32_0 : i32, i32
  }
  func.func @transform_4(%arg0: i32) -> (i32, i32) {
    %c0_i32 = arith.constant 0 : i32
    %c0_i32_0 = arith.constant 0 : i32
    %c0_i32_1 = arith.constant 0 : i32
    return %c0_i32, %c0_i32_0 : i32, i32
  }
  func.func @transform_5(%arg0: i32) -> (i32, i32) {
    %c0_i32 = arith.constant 0 : i32
    %c0_i32_0 = arith.constant 0 : i32
    %c0_i32_1 = arith.constant 0 : i32
    return %c0_i32, %c0_i32_0 : i32, i32
  }
  func.func @transform_6(%arg0: i32) -> (i32, i32) {
    %c0_i32 = arith.constant 0 : i32
    %c0_i32_0 = arith.constant 0 : i32
    %c0_i32_1 = arith.constant 0 : i32
    return %c0_i32, %c0_i32_0 : i32, i32
  }
  func.func @transform_7(%arg0: i32) -> (i32, i32, i32) {
    %c0_i32 = arith.constant 0 : i32
    %c0_i32_0 = arith.constant 0 : i32
    %c0_i32_1 = arith.constant 0 : i32
    return %arg0, %c0_i32, %c0_i32_0 : i32, i32, i32
  }
}

</mosaic_0001>

<bundles_post_ra>
// kernel: tpu_custom_call.1
= control target key start
LH: loop header
LB: loop body
LE: loop exit
PB: predicated region body
PF: predicated region fallthrough
CT: control target
= control target key end

     0   :  { %12 = vsyncpa [#allocation3], 0  ;;  %s1066_s0 = inlined_call_operand.hbm [shape: f32[2,8,32], index: 0, kind: input, shape index: {}]   ;;  %s1067_s1 = inlined_call_operand.hbm [shape: f32[32,384], index: 1, kind: input, shape index: {}]   ;;  %s1068_s2 = inlined_call_operand.vmem [shape: f32[1,384], index: 2, kind: input, shape index: {}]   ;;  %s1069_s3 = inlined_call_operand.vmem [shape: f32[1,32], index: 3, kind: input, shape index: {}]   ;;  %s1070_s4 = inlined_call_operand.vmem [shape: f32[1,32], index: 4, kind: input, shape index: {}]   ;;  %s1071_s5 = inlined_call_operand.vmem [shape: f32[8,32], index: 5, kind: input, shape index: {}]   ;;  %s1072_s6 = inlined_call_operand.vmem [shape: f32[8,1], index: 6, kind: input, shape index: {}]   ;;  %s1073_s7 = inlined_call_operand.hbm [shape: f32[1,8,16], index: 7, kind: output, shape index: {}]  }
   0x1   :  { %13 = vsyncpa [#allocation6], 0 }
   0x2   :  { %14 = vsyncpa [#allocation4], 0  ;;  %s917_s24 = smov [#allocation2]   ;;  %s845_s28 = scalar_lea.hbm %s1066_s0, 256 }
   0x3   :  { %s20_s25 = sshll.u32 %s917_s24, 4  ;;  %p846_p0 = scmp.ne.s32.totalorder %s1066_s0, %s845_s28  ;;  %s21_s25 = int_to_ptr.vmem [resolvable:$true] %s20_s25 }
   0x4   :  { %p849_p1 = scmp.lt.u32.totalorder %s845_s28, %s1066_s0 }
   0x6   :  { %p851_p2 = pnand %p849_p1, %p846_p0 }
   0x8   :  { %854 = shalt.err (!%p851_p2)
}
   0x9   :  { %s855_s10 = scalar_lea.vmem %s21_s25, 256  ;;  %p860_p4 = scmp.lt.s32.totalorder %s21_s25, %s21_s25 }
   0xa   :  { %p856_p3 = scmp.ne.s32.totalorder %s21_s25, %s855_s10  ;;  %p861_p5 = scmp.lt.s32.totalorder %s855_s10, %s855_s10 }
   0xc   :  { %p862_p6 = por %p861_p5, %p860_p4 }
   0xe   :  { %p863_p7 = pnand %p862_p6, %p856_p3 }
  0x10   :  { %866 = shalt.err (!%p863_p7)
}
  0x11   :  { %s918_s11 = smov 128   ;;  %s919_s12 = smov 8  }
  0x12   :  { %26 = dma.hbm_to_vmem [thread:$0]  %s1066_s0, 256, %s21_s25, [#allocation3], %s918_s11, %s918_s11, %s919_s12  }
  0x13   :  { %s920_s15 = smov [#allocation5]   ;;  %s867_s19 = scalar_lea.hbm %s1067_s1, 1536 }
  0x14   :  { %s32_s16 = sshll.u32 %s920_s15, 4  ;;  %p868_p8 = scmp.ne.s32.totalorder %s1067_s1, %s867_s19  ;;  %s33_s16 = int_to_ptr.vmem [resolvable:$true] %s32_s16 }
  0x15   :  { %p871_p9 = scmp.lt.u32.totalorder %s867_s19, %s1067_s1 }
  0x17   :  { %p873_p10 = pnand %p871_p9, %p868_p8 }
  0x19   :  { %876 = shalt.err (!%p873_p10)
}
  0x1a   :  { %s877_s24 = scalar_lea.vmem %s33_s16, 1536  ;;  %p882_p12 = scmp.lt.s32.totalorder %s33_s16, %s33_s16 }
  0x1b   :  { %p878_p11 = scmp.ne.s32.totalorder %s33_s16, %s877_s24  ;;  %p883_p13 = scmp.lt.s32.totalorder %s877_s24, %s877_s24 }
  0x1d   :  { %p884_p0 = por %p883_p13, %p882_p12 }
  0x1f   :  { %p885_p1 = pnand %p884_p0, %p878_p11 }
  0x21   :  { %888 = shalt.err (!%p885_p1)
}
  0x22   :  { %s921_s0 = smov 384   ;;  %s922_s25 = smov 24  }
  0x23   :  { %38 = dma.hbm_to_vmem [thread:$0]  %s1067_s1, 1536, %s33_s16, [#allocation6], %s921_s0, %s921_s0, %s922_s25  }
  0x24   :  { %911 = dma.done.wait [#allocation3], 256  }
  0x25   :  { %912 = vsyncadd [#allocation3], 4294967040 }
  0x26   :  { %913 = dma.done.wait [#allocation6], 1536  }
  0x27   :  { %914 = vsyncadd [#allocation6], 4294965760  ;;  %v923_v0 = vmov 0.0   ;;  %v58_v1 = vld [vmem:[#allocation5 + $0x8] sm:$0xff]  ;;  %v61_v2 = vld [vmem:[#allocation5 + $0x20] sm:$0xff]  ;;  %vm86_vm0 = vcmask 261120   ;;  %v71_v21 = vlaneseq }
  0x28   :  { %157 = vmatprep.mubr.f32.mxu0 %v923_v0  ;;  %v57_v3 = vld [vmem:[#allocation5] sm:$0xff]  ;;  %v797_v4 = vpack.c.bf16 %v61_v2, %v58_v1  ;;  %v60_v5 = vld [vmem:[#allocation5 + $0x18] sm:$0xff]  ;;  %v67_v7 = vld [vmem:[#allocation5 + $0x50] sm:$0xff]  ;;  %vm924_vm1 = vmmov 0   ;;  %vm397_vm2 = vcmask 64512   ;;  %vm709_vm4 = vcmask 130048  }
  0x29   :  { %v64_v6 = vld [vmem:[#allocation5 + $0x38] sm:$0xff]  ;;  %v799_v8 = vpack.c.bf16 %v60_v5, %v57_v3  ;;  %v63_v10 = vld [vmem:[#allocation5 + $0x30] sm:$0xff]  ;;  %v66_v11 = vld [vmem:[#allocation5 + $0x48] sm:$0xff]  ;;  %v72_v22 = vshrl.u32 %v71_v21, 7 }
  0x2a   :  { %v801_v9 = vpack.c.bf16 %v67_v7, %v64_v6  ;;  %v993_v12 = vld [vmem:[#allocation2] sm:$0xff]  ;;  %798 = vmatprep.subr.bf16.mxu0 %v797_v4  ;;  %v62_v14 = vld [vmem:[#allocation5 + $0x28] sm:$0xff]  ;;  %v803_v15 = vpack.c.bf16 %v66_v11, %v63_v10  ;;  %v65_v17 = vld [vmem:[#allocation5 + $0x40] sm:$0xff] }
  0x2b   :  { %v59_v13 = vld [vmem:[#allocation5 + $0x10] sm:$0xff]  ;;  %767 = vmatprep.mubr.msk.f32.mxu1 %vm86_vm0, %v993_v12  ;;  %800 = vmatpush1.bf16.msra.mxu0 %v799_v8  ;;  %v68_v18 = vld [vmem:[#allocation5 + $0x58] sm:$0xff]  ;;  %v77_v23 = vsub.s32 1, %v72_v22  ;;  %v73_v25 = vsub.s32 0, %v72_v22  ;;  %v81_v26 = vsub.s32 2, %v72_v22  ;;  %vm815_vm3 = vmpackc.low %vm86_vm0, %vm86_vm0 }
  0x2c   :  { %v805_v16 = vpack.c.bf16 %v62_v14, %v59_v13  ;;  %802 = vmatprep.subr.bf16.mxu0 %v801_v9  ;;  %v809_v19 = vpack.c.bf16 %v68_v18, %v65_v17  ;;  %v1001_v20 = vld [vmem:[#allocation2 + $0x8] sm:$0xff]  ;;  %v69_v24 = vld [vmem:[%s1068_s2] sm:$0x7] }
  0x2d   :  { %v78_v27 = vrot.slane %v69_v24, %v77_v23  ;;  %v74_v29 = vrot.slane %v69_v24, %v73_v25  ;;  %v82_v31 = vrot.slane %v69_v24, %v81_v26 }
  0x2e   :  { %806 = vmatprep.subr.bf16.mxu1 %v805_v16 }
  0x2f   :  { %808 = vmatpush3.bf16.msra.mxu1 %v805_v16  ;;  %804 = vmatpush1.bf16.msra.mxu0 %v803_v15 }
  0x30   :  { %810 = vmatprep.subr.bf16.mxu1 %v809_v19  ;;  %775 = vmatprep.subr.mxu0 %v923_v0 }
  0x32   :  { %727 = vmatmul.mubr.msk.f32.vlgmr.msra.gmra.mrb[0].mxu0 %vm86_vm0, %v993_v12 }
  0x33   :  { %812 = vmatpush3.bf16.msra.mxu1 %v809_v19  ;;  %163 = vmatprep.mubr.f32.mxu0 %v923_v0 }
  0x34   :  { %770 = vmatprep.subr.mxu1 %v923_v0 }
  0x36   :  { %768 = vmatmul.mubr.msk.f32.vlgmr.msra.gmra.mrb[0].mxu1 %vm86_vm0, %v1001_v20  ;;  %728 = vmatmul.mubr.msk.f32.gmra.mrb[2].mxu0 %vm86_vm0, %v1001_v20 }
  0x37   :  { %772 = vmatprep.mubr.msk.f32.mxu1 %vm924_vm1, %v923_v0  ;;  %777 = vmatprep.mubr.msk.f32.mxu0 %vm924_vm1, %v923_v0 }
 0x105   :  { %v159_v28 = vpop.f32.mrb[0].mxu0 }
 0x106   :  { %v161_v30 = vpop.f32.mrb[1].mxu0  ;;  %v160_v36 = vadd.f32 %v159_v28, %v74_v29 }
 0x107   :  { %v162_v32 = vadd.f32 %v161_v30, %v78_v27  ;;  %v926_v30 = vmov 0  }
 0x108   :  { %828 = vset.pattern.permute.xlu0 %v926_v30 }
 0x109   :  { %v769_v33 = vpop.f32.mrb[0].mxu1  ;;  %v165_v34 = vpop.f32.mrb[2].mxu0  ;;  %771 = vmatpush3.xpose.msk.msra.mxu1 %vm86_vm0, %v162_v32 }
 0x10a   :  { %v236_v35 = vpop.f32.mrb[1].mxu1  ;;  %v167_v37 = vpop.f32.mrb[3].mxu0  ;;  %780 = vmatprep.subr.mxu1 %v923_v0  ;;  %v242_v40 = vadd.f32 %v769_v33, %v82_v31  ;;  %v166_v41 = vadd.f32 %v165_v34, %v74_v29  ;;  %v925_v29 = vmov 0.0|0.0  }
 0x10b   :  { %v237_v38 = vadd.f32 %v236_v35, %v82_v31  ;;  %v168_v39 = vadd.f32 %v167_v37, %v78_v27 }
 0x10c   :  { %773 = vmatmul.mubr.msk.f32.vlgmr.msra.gmra.mrb[2].mxu1 %vm86_vm0, %v160_v36 }
 0x10d   :  { %776 = vmatpush3.xpose.msk.msra.mxu0 %vm86_vm0, %v168_v39  ;;  %781 = vmatpush3.msra.mxu1 %v237_v38  ;;  %v737_v39 = vld [vmem:[%s1069_s3] ss:$0 sm:$0xff]  ;;  %s927_s3 = smov [#allocation7]  }
 0x10e   :  { %785 = vmatprep.subr.mxu0 %v923_v0  ;;  %782 = vmatprep.mubr.msk.f32.mxu1 %vm924_vm1, %v923_v0  ;;  %s717_s12 = sshll.u32 %s927_s3, 4  ;;  %s718_s12 = int_to_ptr.vmem [resolvable:$true] %s717_s12 }
 0x10f   :  { %813 = vmatprep.subr.bf16.mxu1 %v925_v29  ;;  %p894_p3 = scmp.lt.s32.totalorder %s718_s12, %s718_s12 }
 0x110   :  { %778 = vmatmul.mubr.msk.f32.vlgmr.msra.gmra.mrb[4].mxu0 %vm86_vm0, %v166_v41 }
 0x111   :  { %786 = vmatpush3.msra.mxu0 %v242_v40  ;;  %787 = vmatprep.mubr.msk.f32.mxu0 %vm924_vm1, %v923_v0 }
 0x1df   :  { %v317_v42 = vpop.f32.mrb[2].mxu1 }
 0x1e0   :  { %v774_v43 = vpop.f32.mrb[3].mxu1  ;;  %v398_v44 = vsel %vm397_vm2, %v317_v42, -inf }
 0x1e1   :  { %399 = vmax.xlane.f32.xlu0 %v398_v44  ;;  %v738_v43 = vld [vmem:[%s1070_s4] ss:$0 sm:$0xff]  ;;  %s889_s4 = scalar_lea.vmem %s718_s12, 128 }
 0x1e2   :  { %p890_p2 = scmp.ne.s32.totalorder %s718_s12, %s889_s4  ;;  %p895_p4 = scmp.lt.s32.totalorder %s889_s4, %s889_s4 }
 0x1e3   :  { %v393_v45 = vpop.f32.mrb[4].mxu0 }
 0x1e4   :  { %v779_v46 = vpop.f32.mrb[5].mxu0  ;;  %v401_v47 = vsel %vm397_vm2, %v393_v45, -inf  ;;  %p896_p5 = por %p895_p4, %p894_p3 }
 0x1e5   :  { %402 = vmax.xlane.f32.xlu0 %v401_v47 }
 0x1e6   :  { %p897_p6 = pnand %p896_p5, %p890_p2 }
 0x26e   :  { %v400_v48 = vpop.xlane.xlu0 %399 }
 0x26f   :  { %v404_v49 = vsub.f32 %v317_v42, %v400_v48  ;;  %v623_v48 = vld [vmem:[%s1071_s5] sm:$0xff] }
 0x271   :  { %v406_v50 = vmul.f32 1.442695, %v404_v49 }
 0x272   :  { %v403_v51 = vpop.xlane.xlu0 %402 }
 0x273   :  { %829 = vpow2.f32 %v406_v50  ;;  %v405_v52 = vsub.f32 %v393_v45, %v403_v51 }
 0x275   :  { %v408_v53 = vmul.f32 1.442695, %v405_v52 }
 0x277   :  { %831 = vpow2.f32 %v408_v53 }
 0x27d   :  { %v830_v54 = vpop.eup %829 }
 0x27e   :  { %v410_v55 = vsel %vm397_vm2, %v830_v54, 0.0 }
 0x27f   :  { %411 = vadd.xlane.f32.xlu1 %v410_v55 }
 0x281   :  { %v832_v56 = vpop.eup %831 }
 0x282   :  { %v413_v57 = vsel %vm397_vm2, %v832_v56, 0.0 }
 0x283   :  { %414 = vadd.xlane.f32.xlu1 %v413_v57 }
 0x30c   :  { %v412_v58 = vpop.xlane.xlu1 %411 }
 0x30d   :  { %833 = vrcp.f32 %v412_v58 }
 0x310   :  { %v415_v59 = vpop.xlane.xlu1 %414 }
 0x311   :  { %835 = vrcp.f32 %v415_v59 }
 0x317   :  { %v834_v60 = vpop.eup %833 }
 0x318   :  { %v418_v61 = vmul.f32 %v834_v60, %v830_v54 }
 0x31a   :  { %783 = vmatmul.mubr.msk.f32.vlgmr.msra.gmra.mrb[4].mxu1 %vm397_vm2, %v418_v61 }
 0x31b   :  { %v836_v62 = vpop.eup %835  ;;  %794 = vmatprep.mubr.msk.f32.mxu1 %vm924_vm1, %v923_v0 }
 0x31c   :  { %v419_v63 = vmul.f32 %v836_v62, %v832_v56 }
 0x31e   :  { %788 = vmatmul.mubr.msk.f32.vlgmr.msra.gmra.mrb[6].mxu0 %vm397_vm2, %v419_v63 }
 0x3ed   :  { %v489_v1 = vpop.f32.mrb[4].mxu1 }
 0x3ee   :  { %v568_v2 = vmul.f32 0.70710677, %v489_v1  ;;  %v784_v3 = vpop.f32.mrb[5].mxu1  ;;  %v566_v8 = vmul.f32 0.5, %v489_v1 }
 0x3f0   :  { %837 = verf.f32 %v568_v2 }
 0x3f1   :  { %v562_v4 = vpop.f32.mrb[6].mxu0 }
 0x3f2   :  { %v569_v5 = vmul.f32 0.70710677, %v562_v4  ;;  %v789_v6 = vpop.f32.mrb[7].mxu0  ;;  %v567_v13 = vmul.f32 0.5, %v562_v4 }
 0x3f4   :  { %839 = verf.f32 %v569_v5 }
 0x3fa   :  { %v838_v7 = vpop.eup %837 }
 0x3fb   :  { %v572_v9 = vadd.f32 1.0, %v838_v7 }
 0x3fd   :  { %v574_v10 = vmul.f32 %v572_v9, %v566_v8 }
 0x3fe   :  { %v840_v11 = vpop.eup %839 }
 0x3ff   :  { %v573_v14 = vadd.f32 1.0, %v840_v11  ;;  %v576_v0 = vadd.f32 %v574_v10, %v993_v12 }
 0x401   :  { %v575_v15 = vmul.f32 %v573_v14, %v567_v13  ;;  %v578_v16 = vsel %vm86_vm0, %v576_v0, 0.0 }
 0x402   :  { %579 = vadd.xlane.f32.xlu0 %v578_v16 }
 0x403   :  { %v577_v17 = vadd.f32 %v575_v15, %v1001_v20  ;;  %v624_v20 = vld [vmem:[%s1072_s6] sm:$0xff] }
 0x405   :  { %v581_v18 = vsel %vm86_vm0, %v577_v17, 0.0 }
 0x406   :  { %582 = vadd.xlane.f32.xlu1 %v581_v18 }
 0x48f   :  { %v580_v19 = vpop.xlane.xlu0 %579 }
 0x490   :  { %v585_v21 = vmul.f32 0.03125, %v580_v19 }
 0x492   :  { %v587_v22 = vsub.f32 %v576_v0, %v585_v21 }
 0x493   :  { %v583_v23 = vpop.xlane.xlu1 %582 }
 0x494   :  { %v586_v24 = vmul.f32 0.03125, %v583_v23  ;;  %v589_v25 = vmul.f32 %v587_v22, %v587_v22 }
 0x496   :  { %v588_v26 = vsub.f32 %v577_v17, %v586_v24  ;;  %v591_v27 = vsel %vm86_vm0, %v589_v25, 0.0 }
 0x497   :  { %592 = vadd.xlane.f32.xlu0 %v591_v27 }
 0x498   :  { %v590_v12 = vmul.f32 %v588_v26, %v588_v26 }
 0x49a   :  { %v594_v28 = vsel %vm86_vm0, %v590_v12, 0.0 }
 0x49b   :  { %595 = vadd.xlane.f32.xlu1 %v594_v28 }
 0x4ad   :  { %627 = vperm.xlu0 %828, %v624_v20  }
 0x524   :  { %v593_v31 = vpop.xlane.xlu0 %592 }
 0x525   :  { %v597_v32 = vmul.f32 0.03125, %v593_v31 }
 0x527   :  { %v599_v33 = vadd.f32 1e-05, %v597_v32 }
 0x528   :  { %v596_v34 = vpop.xlane.xlu1 %595 }
 0x529   :  { %841 = vrsqrt.f32 %v599_v33  ;;  %v598_v35 = vmul.f32 0.03125, %v596_v34 }
 0x52b   :  { %v600_v36 = vadd.f32 1e-05, %v598_v35 }
 0x52c   :  { %v628_v49 = vpop.permute.xlu0 %627 }
 0x52d   :  { %843 = vrsqrt.f32 %v600_v36 }
 0x533   :  { %v842_v37 = vpop.eup %841 }
 0x534   :  { %v603_v38 = vmul.f32 %v842_v37, %v587_v22 }
 0x536   :  { %v612_v41 = vmul.f32 %v737_v39, %v603_v38 }
 0x537   :  { %v844_v40 = vpop.eup %843 }
 0x538   :  { %v604_v42 = vmul.f32 %v844_v40, %v588_v26  ;;  %v621_v45 = vadd.f32 %v738_v43, %v612_v41 }
 0x53a   :  { %v613_v44 = vmul.f32 %v737_v39, %v604_v42 }
 0x53c   :  { %v622_v46 = vadd.f32 %v738_v43, %v613_v44 }
 0x53e   :  { %v814_v47 = vpack.c.bf16 %v622_v46, %v621_v45 }
 0x540   :  { %816 = vmatpush3.bf16.xpose.msk.msra.mxu1 %vm815_vm3, %v814_v47 }
 0x547   :  { %795 = vmatmul.mubr.msk.f32.vlgmr.msra.gmra.mrb[6].mxu1 %vm86_vm0, %v623_v48 }
 0x61a   :  { %v705_v50 = vpop.f32.mrb[6].mxu1 }
 0x61b   :  { %v706_v51 = vadd.f32 %v705_v50, %v628_v49  ;;  %v796_v52 = vpop.f32.mrb[7].mxu1 }
 0x61d   :  { %710 = vst.msk [vmem:[#allocation7] sm:$0xff] %vm709_vm4, %v706_v51 }
 0x61e   :  { %900 = shalt.err (!%p897_p6)
}
 0x61f   :  { %s901_s14 = scalar_lea.hbm %s1073_s7, 128 }
 0x620   :  { %p902_p7 = scmp.ne.s32.totalorder %s1073_s7, %s901_s14  ;;  %p905_p8 = scmp.lt.u32.totalorder %s901_s14, %s1073_s7 }
 0x622   :  { %p907_p9 = pnand %p905_p8, %p902_p7 }
 0x624   :  { %910 = shalt.err (!%p907_p9)
}
 0x625   :  { %720 = dma.vmem_to_hbm [thread:$0]  %s718_s12, 128, %s1073_s7, [#allocation4]  }
 0x626   :  { %915 = dma.done.wait [#allocation4], 128  }
 0x627   :  { %916 = vsyncadd [#allocation4], 4294967168 }
 0x628   :  { %724 = vsyncpa [#allocation3], 1 }
 0x629   :  { %725 = vsyncpa [#allocation6], 1 }
 0x62a   :  { %726 = vsyncpa [#allocation4], 1 }

</bundles_post_ra>
